<compile_context>
chip_gen: v7x
topology: tpu7x:2x2x1
jax: 0.10.0
libtpu: 0.0.40
codegen_flags: <defaults>
</compile_context>

<pallas_src>
from functools import lru_cache

import jax
import jax.numpy as jnp
from jax.experimental import pallas as pl
from jax.experimental.pallas import tpu as pltpu


# ----------------------------- hardware queries ------------------------------

_TM_MAX = 4096                      # row-tile cap
_VMEM_LIMIT_CACHE = None
_USE_CORE_PARALLEL_CACHE = None


def _vmem_limit_bytes():
    """Scoped-VMEM limit to request: ~45% of physical VMEM, capped at 48 MiB.
    Fallback assumes 64 MiB (v7x per-TC size), which is safe on every chip."""
    global _VMEM_LIMIT_CACHE
    if _VMEM_LIMIT_CACHE is None:
        cap = 64 * 1024 * 1024
        try:
            cap = int(pltpu.get_tpu_info().vmem_capacity_bytes)
        except Exception:
            pass
        _VMEM_LIMIT_CACHE = int(min(0.45 * cap, 48 * 1024 * 1024))
    return _VMEM_LIMIT_CACHE


def _tile_budget_bytes():
    # Keep headroom under the requested limit (compiler-internal scratch etc.).
    return int(0.85 * _vmem_limit_bytes())


def _grid_semantics(n_axes):
    """CORE_PARALLEL on the leading (row) axis for v7x's two TensorCores;
    plain 'parallel' strings everywhere else."""
    global _USE_CORE_PARALLEL_CACHE
    if _USE_CORE_PARALLEL_CACHE is None:
        use_cp = False
        try:
            kind = jax.devices()[0].device_kind.lower()
            use_cp = ("v7" in kind) and hasattr(pltpu, "CORE_PARALLEL")
        except Exception:
            pass
        _USE_CORE_PARALLEL_CACHE = use_cp
    if _USE_CORE_PARALLEL_CACHE:
        return (pltpu.CORE_PARALLEL,) + (pltpu.PARALLEL,) * (n_axes - 1)
    return ("parallel",) * n_axes


# ----------------------------- tiling helpers -------------------------------

def _sublane_multiple(dtype):
    itemsize = jnp.dtype(dtype).itemsize
    return {4: 8, 2: 16, 1: 32}.get(itemsize, 8)


def _choose_row_tile(M, bytes_per_row, dtype, tile_budget):
    """Row-only tiling: biggest row tile whose double-buffered streams fit."""
    sub = _sublane_multiple(dtype)
    tm = tile_budget // max(1, 2 * bytes_per_row)        # 2x: double-buffering
    tm = max(sub, min(_TM_MAX, (tm // sub) * sub))
    if tm >= M:
        return M                                         # full extent is legal
    return tm


def _choose_tiles_2d(M, D, n_streams, dtype, tile_budget):
    """(rows, lanes) tile for the add path.  If the full feature width forces
    tiny row tiles, shrink the lane tile (128-multiples) so rows stay >=512."""
    itemsize = jnp.dtype(dtype).itemsize
    sub = _sublane_multiple(dtype)
    per_stream = max(1, tile_budget // (2 * n_streams))  # 2x: double-buffering

    def rows_for(td):
        tm = per_stream // max(1, td * itemsize)
        tm = min(tm, _TM_MAX)
        return max(sub, (tm // sub) * sub)

    td = D
    tm = rows_for(td)
    if tm < 512 and M > tm and D % 128 == 0 and D > 128:
        want_rows = min(_TM_MAX, ((min(512, M) + sub - 1) // sub) * sub)
        td_new = per_stream // max(1, want_rows * itemsize)
        td_new = max(128, (td_new // 128) * 128)
        td = min(td_new, D)
        tm = rows_for(td)
    if tm >= M:
        tm = M
    return tm, td


# ----------------------------- Pallas kernels ------------------------------

def _add_fusion_kernel_native(*refs):
    """Elementwise sum of V view tiles, accumulating in the native dtype."""
    *in_refs, o_ref = refs
    acc = in_refs[0][...]
    for r in in_refs[1:]:
        acc = acc + r[...]
    o_ref[...] = acc.astype(o_ref.dtype)


def _add_fusion_kernel_f32acc(*refs):
    """Elementwise sum with f32 accumulation (half-precision inputs)."""
    *in_refs, o_ref = refs
    acc = in_refs[0][...].astype(jnp.float32)
    for r in in_refs[1:]:
        acc = acc + r[...].astype(jnp.float32)
    o_ref[...] = acc.astype(o_ref.dtype)


def _concat_kernel_aligned(*refs):
    """Per-view slab stores; every offset/width is 128-lane aligned."""
    *in_refs, o_ref = refs
    off = 0
    for r in in_refs:
        d = r.shape[-1]
        o_ref[:, off:off + d] = r[...]
        off += d


def _concat_kernel_unaligned(*refs):
    """Unaligned widths: concatenate in-register, single lane-dense store."""
    *in_refs, o_ref = refs
    o_ref[...] = jnp.concatenate([r[...] for r in in_refs], axis=-1)


# -------------------------- cached pallas_call builders ----------------------

@lru_cache(maxsize=None)
def _build_add_fusion(M, D, V, dtype_name):
    dtype = jnp.dtype(dtype_name)
    itemsize = dtype.itemsize
    tm, td = _choose_tiles_2d(M, D, V + 1, dtype, _tile_budget_bytes())

    kernel = (_add_fusion_kernel_f32acc
              if dtype in (jnp.bfloat16, jnp.float16)
              else _add_fusion_kernel_native)

    spec = pl.BlockSpec((tm, td), lambda i, j: (i, j))
    grid = (pl.cdiv(M, tm), pl.cdiv(D, td))
    cost = pl.CostEstimate(flops=int((V - 1) * M * D),
                           transcendentals=0,
                           bytes_accessed=int((V + 1) * M * D * itemsize))
    call = pl.pallas_call(
        kernel,
        out_shape=jax.ShapeDtypeStruct((M, D), dtype),
        grid=grid,
        in_specs=[spec] * V,
        out_specs=spec,
        compiler_params=pltpu.CompilerParams(
            dimension_semantics=_grid_semantics(2),
            vmem_limit_bytes=_vmem_limit_bytes()),
        cost_estimate=cost,
    )
    return jax.jit(call)


@lru_cache(maxsize=None)
def _build_concat_fusion(M, dims, dtype_name):
    dtype = jnp.dtype(dtype_name)
    itemsize = dtype.itemsize
    D_total = sum(dims)
    tm = _choose_row_tile(M, 2 * D_total * itemsize, dtype, _tile_budget_bytes())

    aligned = all(d % 128 == 0 for d in dims)
    kernel = _concat_kernel_aligned if aligned else _concat_kernel_unaligned

    in_specs = [pl.BlockSpec((tm, d), lambda i: (i, 0)) for d in dims]
    out_spec = pl.BlockSpec((tm, D_total), lambda i: (i, 0))
    cost = pl.CostEstimate(flops=0,
                           transcendentals=0,
                           bytes_accessed=int(2 * M * D_total * itemsize))
    call = pl.pallas_call(
        kernel,
        out_shape=jax.ShapeDtypeStruct((M, D_total), dtype),
        grid=(pl.cdiv(M, tm),),
        in_specs=in_specs,
        out_specs=out_spec,
        compiler_params=pltpu.CompilerParams(
            dimension_semantics=_grid_semantics(1),
            vmem_limit_bytes=_vmem_limit_bytes()),
        cost_estimate=cost,
    )
    return jax.jit(call)


# ------------------------------ Python wrapper ------------------------------

class MultiviewDecoder:
    """JAX/Pallas port of the PyTorch MultiviewDecoder base class."""

    def __init__(self, feature_dim, num_views=None, mode='concat'):
        self.feature_dim = feature_dim
        self.num_views = num_views
        self.mode = mode
        # NOTE: the base class has no learnable parameters (only fusion logic).

    # -- add fusion: torch.sum(torch.stack(x_list, 0), 0) --
    def add_fusion(self, *x_list):
        if not x_list:
            return None
        B, S, D = x_list[0].shape
        V = len(x_list)
        dtype = jnp.dtype(x_list[0].dtype)
        M = B * S
        fn = _build_add_fusion(M, D, V, dtype.name)
        out = fn(*[x.reshape(M, D) for x in x_list])
        return out.reshape(B, S, D)

    # -- concat fusion: torch.cat(x_list, dim=-1) --
    def concat_fusion(self, *x_list):
        B, S, _ = x_list[0].shape
        dtype = jnp.dtype(x_list[0].dtype)
        M = B * S
        dims = tuple(int(x.shape[-1]) for x in x_list)
        D_total = sum(dims)
        fn = _build_concat_fusion(M, dims, dtype.name)
        out = fn(*[x.reshape(M, d) for x, d in zip(x_list, dims)])
        return out.reshape(B, S, D_total)

    def attention_fusion(self, *x_list, target_domains=None):
        # TODO(synk): base class references self.attention which is undefined
        # in the PyTorch module; no semantics to reproduce here.
        raise NotImplementedError("attention fusion is not defined in the base class")

    def forward(self, *x_list, **kwargs):
        if self.num_views is not None and len(x_list) != self.num_views:
            raise ValueError(
                f'Expected {self.num_views} inputs, got {len(x_list)}')
        if self.mode == 'add':
            return self.add_fusion(*x_list)
        elif self.mode == 'concat':
            return self.concat_fusion(*x_list)
        elif self.mode == 'attention':
            return self.attention_fusion(*x_list, **kwargs)
        else:
            raise ValueError('Invalid fusion mode')

    __call__ = forward


# ----------------------------------- main -----------------------------------

if __name__ == "__main__":
    key = jax.random.PRNGKey(0)

    # --- small shapes: single grid step (full-extent block) ------------------
    B, S, D, V = 2, 8, 128, 3
    keys = jax.random.split(key, V)
    views = [jax.random.normal(k, (B, S, D), dtype=jnp.float32) for k in keys]

    dec_concat = MultiviewDecoder(feature_dim=D, num_views=V, mode='concat')
    out_concat = jax.block_until_ready(dec_concat(*views))
    ref_concat = jnp.concatenate(views, axis=-1)
    assert out_concat.shape == (B, S, V * D)
    assert jnp.allclose(out_concat, ref_concat, atol=1e-6), "concat mismatch"

    dec_add = MultiviewDecoder(feature_dim=D, num_views=V, mode='add')
    out_add = jax.block_until_ready(dec_add(*views))
    ref_add = jnp.sum(jnp.stack(views, axis=0), axis=0)
    assert out_add.shape == (B, S, D)
    assert jnp.allclose(out_add, ref_add, atol=1e-5), "add mismatch"

    # --- larger shapes: exercises the row-tiled grid (multiple steps) --------
    B2, S2, D2 = 4, 1536, 256
    keys2 = jax.random.split(jax.random.PRNGKey(1), V)
    views2 = [jax.random.normal(k, (B2, S2, D2), dtype=jnp.float32) for k in keys2]

    out_c2 = jax.block_until_ready(
        MultiviewDecoder(D2, num_views=V, mode='concat')(*views2))
    assert jnp.allclose(out_c2, jnp.concatenate(views2, axis=-1), atol=1e-6), \
        "tiled concat mismatch"

    out_a2 = jax.block_until_ready(
        MultiviewDecoder(D2, num_views=V, mode='add')(*views2))
    assert jnp.allclose(out_a2, jnp.sum(jnp.stack(views2, 0), 0), atol=1e-4), \
        "tiled add mismatch"

    # --- wide features: exercises the (rows, lanes) 2-D grid for add ---------
    B3, S3, D3 = 2, 512, 4096
    keys3 = jax.random.split(jax.random.PRNGKey(5), V)
    views3 = [jax.random.normal(k, (B3, S3, D3), dtype=jnp.float32) for k in keys3]
    out_a3 = jax.block_until_ready(
        MultiviewDecoder(D3, num_views=V, mode='add')(*views3))
    assert jnp.allclose(out_a3, jnp.sum(jnp.stack(views3, 0), 0), atol=1e-4), \
        "wide add mismatch"

    # --- bf16 add: f32 accumulation path --------------------------------------
    views_bf = [v.astype(jnp.bfloat16) for v in views]
    out_abf = jax.block_until_ready(
        MultiviewDecoder(D, num_views=V, mode='add')(*views_bf))
    ref_abf = jnp.sum(jnp.stack([v.astype(jnp.float32) for v in views_bf], 0),
                      0).astype(jnp.bfloat16)
    assert out_abf.dtype == jnp.bfloat16
    assert jnp.allclose(out_abf.astype(jnp.float32),
                        ref_abf.astype(jnp.float32), atol=3e-2), "bf16 add mismatch"

    # --- concat with unequal, 128-aligned per-view feature dims ---------------
    mixed = [jax.random.normal(jax.random.PRNGKey(2), (B, S, 128), jnp.float32),
             jax.random.normal(jax.random.PRNGKey(3), (B, S, 256), jnp.float32),
             jax.random.normal(jax.random.PRNGKey(4), (B, S, 128), jnp.float32)]
    out_mix = jax.block_until_ready(
        MultiviewDecoder(128, num_views=3, mode='concat')(*mixed))
    assert jnp.allclose(out_mix, jnp.concatenate(mixed, axis=-1), atol=1e-6), \
        "mixed-width concat mismatch"

    # --- concat with non-128-aligned widths (in-register concat fallback) -----
    odd = [jax.random.normal(jax.random.PRNGKey(6), (B, S, 64), jnp.float32),
           jax.random.normal(jax.random.PRNGKey(7), (B, S, 192), jnp.float32)]
    out_odd = jax.block_until_ready(
        MultiviewDecoder(64, num_views=2, mode='concat')(*odd))
    assert jnp.allclose(out_odd, jnp.concatenate(odd, axis=-1), atol=1e-6), \
        "unaligned concat mismatch"

    print("KERNEL_OK")
</pallas_src>

<mosaic_0001>
module attributes {stable_mosaic.version = 11 : i64} {
  func.func @_concat_kernel_aligned(%arg0: i32, %arg1: memref<16x128xf32, #tpu.memory_space<vmem>>, %arg2: memref<16x128xf32, #tpu.memory_space<vmem>>, %arg3: memref<16x128xf32, #tpu.memory_space<vmem>>, %arg4: memref<16x384xf32, #tpu.memory_space<vmem>>) attributes {dimension_semantics = [#tpu.dimension_semantics<parallel>], iteration_bounds = array<i64: 1>, scalar_prefetch = 0 : i64, scratch_operands = 0 : i64, tpu.core_type = #tpu.core_type<tc>, window_params = [{transform_indices = @transform_0, window_bounds = array<i64: 16, 128>}, {transform_indices = @transform_1, window_bounds = array<i64: 16, 128>}, {transform_indices = @transform_2, window_bounds = array<i64: 16, 128>}, {transform_indices = @transform_3, window_bounds = array<i64: 16, 384>}]} {
    %c0 = arith.constant 0 : index
    %c0_0 = arith.constant 0 : index
    %0 = vector.load %arg1[%c0, %c0_0] : memref<16x128xf32, #tpu.memory_space<vmem>>, vector<16x128xf32>
    %c0_1 = arith.constant 0 : index
    %c0_2 = arith.constant 0 : index
    %1 = vector.load %arg4[%c0_1, %c0_2] : memref<16x384xf32, #tpu.memory_space<vmem>>, vector<16x128xf32>
    tpu.vector_store %arg4[%c0_1, %c0_2], %0 {strides = array<i32>} : memref<16x384xf32, #tpu.memory_space<vmem>>, vector<16x128xf32>,
    %c0_3 = arith.constant 0 : index
    %c0_4 = arith.constant 0 : index
    %2 = vector.load %arg2[%c0_3, %c0_4] : memref<16x128xf32, #tpu.memory_space<vmem>>, vector<16x128xf32>
    %c0_5 = arith.constant 0 : index
    %c128 = arith.constant 128 : index
    %3 = vector.load %arg4[%c0_5, %c128] : memref<16x384xf32, #tpu.memory_space<vmem>>, vector<16x128xf32>
    tpu.vector_store %arg4[%c0_5, %c128], %2 {strides = array<i32>} : memref<16x384xf32, #tpu.memory_space<vmem>>, vector<16x128xf32>,
    %c0_6 = arith.constant 0 : index
    %c0_7 = arith.constant 0 : index
    %4 = vector.load %arg3[%c0_6, %c0_7] : memref<16x128xf32, #tpu.memory_space<vmem>>, vector<16x128xf32>
    %c0_8 = arith.constant 0 : index
    %c256 = arith.constant 256 : index
    %5 = vector.load %arg4[%c0_8, %c256] : memref<16x384xf32, #tpu.memory_space<vmem>>, vector<16x128xf32>
    tpu.vector_store %arg4[%c0_8, %c256], %4 {strides = array<i32>} : memref<16x384xf32, #tpu.memory_space<vmem>>, vector<16x128xf32>,
    return
  }
  func.func @transform_0(%arg0: i32) -> (i32, i32) {
    %c0_i32 = arith.constant 0 : i32
    %c0_i32_0 = arith.constant 0 : i32
    return %arg0, %c0_i32 : i32, i32
  }
  func.func @transform_1(%arg0: i32) -> (i32, i32) {
    %c0_i32 = arith.constant 0 : i32
    %c0_i32_0 = arith.constant 0 : i32
    return %arg0, %c0_i32 : i32, i32
  }
  func.func @transform_2(%arg0: i32) -> (i32, i32) {
    %c0_i32 = arith.constant 0 : i32
    %c0_i32_0 = arith.constant 0 : i32
    return %arg0, %c0_i32 : i32, i32
  }
  func.func @transform_3(%arg0: i32) -> (i32, i32) {
    %c0_i32 = arith.constant 0 : i32
    %c0_i32_0 = arith.constant 0 : i32
    return %arg0, %c0_i32 : i32, i32
  }
}

</mosaic_0001>

<bundles_post_ra>
// kernel: tpu_custom_call.1
= control target key start
LH: loop header
LB: loop body
LE: loop exit
PB: predicated region body
PF: predicated region fallthrough
CT: control target
= control target key end

     0   :  { %8 = vsyncpa [#allocation3], 0  ;;  %s280_s0 = inlined_call_operand.hbm [shape: f32[16,128], index: 0, kind: input, shape index: {}]   ;;  %s281_s1 = inlined_call_operand.hbm [shape: f32[16,128], index: 1, kind: input, shape index: {}]   ;;  %s282_s2 = inlined_call_operand.hbm [shape: f32[16,128], index: 2, kind: input, shape index: {}]   ;;  %s283_s3 = inlined_call_operand.hbm [shape: f32[16,384], index: 3, kind: output, shape index: {}]  }
   0x1   :  { %9 = vsyncpa [#allocation6], 0 }
   0x2   :  { %10 = vsyncpa [#allocation4], 0  ;;  %s188_s12 = smov [#allocation5]   ;;  %s189_s14 = smov [#allocation2]  }
   0x3   :  { %s28_s13 = sshll.u32 %s188_s12, 4  ;;  %s16_s15 = sshll.u32 %s189_s14, 4  ;;  %s29_s13 = int_to_ptr.vmem [resolvable:$true] %s28_s13  ;;  %s216_s15 = int_to_ptr.vmem [resolvable:$true] %s16_s15 }
   0x4   :  { %s94_s18 = scalar_lea.hbm %s281_s1, 256 }
   0x5   :  { %p95_p0 = scmp.ne.s32.totalorder %s281_s1, %s94_s18  ;;  %p98_p1 = scmp.lt.u32.totalorder %s94_s18, %s281_s1 }
   0x7   :  { %p100_p2 = pnand %p98_p1, %p95_p0 }
   0x9   :  { %103 = shalt.err (!%p100_p2)
}
   0xa   :  { %s104_s23 = scalar_lea.vmem %s29_s13, 256  ;;  %p109_p4 = scmp.lt.s32.totalorder %s29_s13, %s29_s13 }
   0xb   :  { %p105_p3 = scmp.ne.s32.totalorder %s29_s13, %s104_s23  ;;  %p110_p5 = scmp.lt.s32.totalorder %s104_s23, %s104_s23 }
   0xd   :  { %p111_p6 = por %p110_p5, %p109_p4 }
   0xf   :  { %p112_p7 = pnand %p111_p6, %p105_p3 }
  0x11   :  { %115 = shalt.err (!%p112_p7)
}
  0x12   :  { %s190_s24 = smov 128   ;;  %s191_s25 = smov 8  }
  0x13   :  { %34 = dma.hbm_to_vmem [thread:$0]  %s281_s1, 256, %s29_s13, [#allocation6], %s190_s24, %s190_s24, %s191_s25  }
  0x14   :  { %s116_s30 = scalar_lea.hbm %s280_s0, 256 }
  0x15   :  { %p117_p8 = scmp.ne.s32.totalorder %s280_s0, %s116_s30  ;;  %p120_p9 = scmp.lt.u32.totalorder %s116_s30, %s280_s0 }
  0x17   :  { %p122_p10 = pnand %p120_p9, %p117_p8 }
  0x19   :  { %125 = shalt.err (!%p122_p10)
}
  0x1a   :  { %s126_s8 = scalar_lea.vmem %s216_s15, 256  ;;  %p131_p12 = scmp.lt.s32.totalorder %s216_s15, %s216_s15 }
  0x1b   :  { %p127_p11 = scmp.ne.s32.totalorder %s216_s15, %s126_s8  ;;  %p132_p13 = scmp.lt.s32.totalorder %s126_s8, %s126_s8 }
  0x1d   :  { %p133_p0 = por %p132_p13, %p131_p12 }
  0x1f   :  { %p134_p1 = pnand %p133_p0, %p127_p11 }
  0x21   :  { %137 = shalt.err (!%p134_p1)
}
  0x22   :  { %22 = dma.hbm_to_vmem [thread:$0]  %s280_s0, 256, %s216_s15, [#allocation3], %s190_s24, %s190_s24, %s191_s25  }
  0x23   :  { %s192_s10 = smov [#allocation7]   ;;  %s138_s14 = scalar_lea.hbm %s282_s2, 256 }
  0x24   :  { %s40_s11 = sshll.u32 %s192_s10, 4  ;;  %p139_p2 = scmp.ne.s32.totalorder %s282_s2, %s138_s14  ;;  %s41_s11 = int_to_ptr.vmem [resolvable:$true] %s40_s11 }
  0x25   :  { %p142_p3 = scmp.lt.u32.totalorder %s138_s14, %s282_s2 }
  0x27   :  { %p144_p4 = pnand %p142_p3, %p139_p2 }
  0x29   :  { %147 = shalt.err (!%p144_p4)
}
  0x2a   :  { %s148_s20 = scalar_lea.vmem %s41_s11, 256  ;;  %p153_p6 = scmp.lt.s32.totalorder %s41_s11, %s41_s11 }
  0x2b   :  { %p149_p5 = scmp.ne.s32.totalorder %s41_s11, %s148_s20  ;;  %p154_p7 = scmp.lt.s32.totalorder %s148_s20, %s148_s20 }
  0x2d   :  { %p155_p8 = por %p154_p7, %p153_p6 }
  0x2f   :  { %p156_p9 = pnand %p155_p8, %p149_p5 }
  0x31   :  { %159 = shalt.err (!%p156_p9)
}
  0x32   :  { %46 = dma.hbm_to_vmem [thread:$0]  %s282_s2, 256, %s41_s11, [#allocation6], %s190_s24, %s190_s24, %s191_s25  }
  0x33   :  { %182 = dma.done.wait [#allocation3], 256  }
  0x34   :  { %183 = vsyncadd [#allocation3], 4294967040 }
  0x35   :  { %184 = dma.done.wait [#allocation6], 512  }
  0x36   :  { %185 = vsyncadd [#allocation6], 4294966784  ;;  %s193_s21 = smov [#allocation8]   ;;  %v56_v0 = vld [vmem:[#allocation2] sm:$0xff]  ;;  %v57_v1 = vld [vmem:[#allocation2 + $0x8] sm:$0xff] }
  0x37   :  { %s73_s22 = sshll.u32 %s193_s21, 4  ;;  %v60_v2 = vld [vmem:[#allocation5] sm:$0xff]  ;;  %58 = vst [vmem:[#allocation8] sm:$0xff] %v56_v0  ;;  %59 = vst [vmem:[#allocation8 + $0x18] sm:$0xff] %v57_v1  ;;  %v61_v3 = vld [vmem:[#allocation5 + $0x8] sm:$0xff]  ;;  %s74_s22 = int_to_ptr.vmem [resolvable:$true] %s73_s22 }
  0x38   :  { %62 = vst [vmem:[#allocation8 + $0x8] sm:$0xff] %v60_v2  ;;  %v64_v4 = vld [vmem:[#allocation7] sm:$0xff]  ;;  %v65_v5 = vld [vmem:[#allocation7 + $0x8] sm:$0xff]  ;;  %63 = vst [vmem:[#allocation8 + $0x20] sm:$0xff] %v61_v3  ;;  %s160_s2 = scalar_lea.vmem %s74_s22, 768  ;;  %p165_p11 = scmp.lt.s32.totalorder %s74_s22, %s74_s22 }
  0x39   :  { %66 = vst [vmem:[#allocation8 + $0x10] sm:$0xff] %v64_v4  ;;  %67 = vst [vmem:[#allocation8 + $0x28] sm:$0xff] %v65_v5  ;;  %p161_p10 = scmp.ne.s32.totalorder %s74_s22, %s160_s2  ;;  %p166_p12 = scmp.lt.s32.totalorder %s160_s2, %s160_s2 }
  0x3b   :  { %p167_p13 = por %p166_p12, %p165_p11 }
  0x3d   :  { %p168_p0 = pnand %p167_p13, %p161_p10 }
  0x3f   :  { %171 = shalt.err (!%p168_p0)
}
  0x40   :  { %s172_s25 = scalar_lea.hbm %s283_s3, 768 }
  0x41   :  { %p173_p1 = scmp.ne.s32.totalorder %s283_s3, %s172_s25  ;;  %p176_p2 = scmp.lt.u32.totalorder %s172_s25, %s283_s3 }
  0x43   :  { %p178_p3 = pnand %p176_p2, %p173_p1 }
  0x45   :  { %181 = shalt.err (!%p178_p3)
}
  0x46   :  { %s194_s30 = smov 384   ;;  %s195_s4 = smov 24  }
  0x47   :  { %79 = dma.vmem_to_hbm [thread:$0]  %s74_s22, 768, %s283_s3, [#allocation4], %s194_s30, %s194_s30, %s195_s4  }
  0x48   :  { %186 = dma.done.wait [#allocation4], 768  }
  0x49   :  { %187 = vsyncadd [#allocation4], 4294966528 }
  0x4a   :  { %83 = vsyncpa [#allocation3], 1 }
  0x4b   :  { %84 = vsyncpa [#allocation6], 1 }
  0x4c   :  { %85 = vsyncpa [#allocation4], 1 }

</bundles_post_ra>
